<compile_context>
chip_gen: v7x
topology: tpu7x:2x2x1
jax: 0.10.0
libtpu: 0.0.40
codegen_flags: <defaults>
</compile_context>

<pallas_src>
import functools

import jax
import jax.numpy as jnp
from jax.experimental import pallas as pl
from jax.experimental.pallas import tpu as pltpu


def _round_up(x, m):
    return ((x + m - 1) // m) * m


def _patch_embed_kernel(x_ref, w_ref, b_ref, o_ref):
    """x_ref: (TM, Kp) patch tile, w_ref: (Kp, Dp) resident weight.T,
    b_ref: (1, Dp) f32 bias, o_ref: (TM, Dp) output tile."""
    acc = jnp.dot(x_ref[...], w_ref[...], preferred_element_type=jnp.float32)
    o_ref[...] = (acc + b_ref[...]).astype(o_ref.dtype)


def _vmem_limits():
    """Returns (vmem_limit_bytes, tile_budget_bytes) sized from the chip."""
    try:
        phys = int(pltpu.get_tpu_info().vmem_capacity_bytes)
    except Exception:  # conservative fallback (v7x-sized: 64 MiB per core)
        phys = 64 * 1024 * 1024
    limit = min(phys * 3 // 4, 112 * 1024 * 1024)  # leave headroom for internals
    return int(limit), int(limit // 2)


def _choose_tile_m(M, tile_m, per_row_bytes, fixed_bytes, budget_bytes):
    """Pick the M tile: multiple of 128 (MXU / sublane friendly), VMEM-bounded,
    and with enough grid steps to hide the DMA ramp / feed both v7x cores."""
    if M <= 256:
        # Single block covering all rows (exact when M is a multiple of 8).
        return max(8, _round_up(M, 8))
    cap = (budget_bytes - fixed_bytes) // max(per_row_bytes, 1)
    cap = max(128, (cap // 128) * 128)
    # Aim for >= ~8 grid steps, but never shrink below 512 rows per step.
    target = max(512, _round_up(pl.cdiv(M, 8), 128))
    tm = min(max(128, (tile_m // 128) * 128), cap, target)
    return int(min(max(tm, 128), _round_up(M, 128)))


def patch_embedding(x, weight, bias, patch_size, *, tile_m=2048,
                    compute_dtype=jnp.bfloat16, out_dtype=jnp.bfloat16,
                    allow_input_fusion=True):
    """Forward pass identical to the PyTorch PatchEmbedding module.

    Args:
      x:      (B, C, H, W)  NCHW input image.
      weight: (D, C, P, P)  conv weight.
      bias:   (D,)          conv bias.
    Returns:
      (B, N, D) with N = (H // P) * (W // P), dtype `out_dtype`.
    """
    B, C, H, W = x.shape
    D = weight.shape[0]
    P = patch_size
    Hp, Wp = H // P, W // P
    N = Hp * Wp

    # Match PyTorch Conv2d(stride=P): silently crop any H/W remainder.
    if (Hp * P, Wp * P) != (H, W):
        x = x[:, :, : Hp * P, : Wp * P]

    # im2col for a stride==kernel conv: each patch flattened over (c, i, j) in
    # the same order as the flattened conv weight. With allow_input_fusion the
    # producer chain (reshape/transpose/cast) may be fused into the kernel's
    # input DMA so the (M, K) patch matrix is never materialized in HBM.
    # TODO(synk): if XLA declines the fusion, reading raw NCHW slabs with a
    # (1, C, P, W) BlockSpec and doing the (C,P,Wp,P)->(Wp,K) reorder in VMEM
    # would remove the extra HBM pass entirely.
    patches = x.reshape(B, C, Hp, P, Wp, P)
    patches = patches.transpose(0, 2, 4, 1, 3, 5)          # (B, Hp, Wp, C, P, P)
    patches = patches.reshape(B * N, C * P * P).astype(compute_dtype)  # (M, K)
    w_mat = weight.reshape(D, C * P * P).T.astype(compute_dtype)       # (K, D)

    M, K = patches.shape

    # Zero-pad only the lane axes (K, D) up to multiples of 128 — no-ops for
    # standard ViT shapes (K=D=768). M is NOT padded: the last block is ragged.
    Kp = _round_up(K, 128)
    Dp = _round_up(D, 128)
    if Kp != K:
        patches = jnp.pad(patches, ((0, 0), (0, Kp - K)))
        w_mat = jnp.pad(w_mat, ((0, Kp - K), (0, 0)))
    if Dp != D:
        w_mat = jnp.pad(w_mat, ((0, 0), (0, Dp - D)))
    b_mat = bias.astype(jnp.float32).reshape(1, D)
    if Dp != D:
        b_mat = jnp.pad(b_mat, ((0, 0), (0, Dp - D)))

    c_size = jnp.dtype(compute_dtype).itemsize
    o_size = jnp.dtype(out_dtype).itemsize
    vmem_limit, tile_budget = _vmem_limits()
    # Double-buffered streamed input/output rows + resident (double-buffered)
    # weight and bias. (pl.Buffered(1) on the resident operands would halve the
    # weight footprint; kept conservative and accounted for in the budget.)
    per_row = 2 * (Kp * c_size + Dp * o_size)
    fixed = 2 * Kp * Dp * c_size + 2 * Dp * 4
    # TODO(synk): for D >= ~4096 add a D grid axis (Dp tiles of 512-1024) so the
    # resident weight also fits v5e/v7x VMEM budgets.
    TM = _choose_tile_m(M, tile_m, per_row, fixed, tile_budget)

    grid = (pl.cdiv(M, TM),)
    cost = pl.CostEstimate(
        flops=2 * M * Kp * Dp,
        transcendentals=0,
        bytes_accessed=M * Kp * c_size + Kp * Dp * c_size + M * Dp * o_size,
    )

    out = pl.pallas_call(
        _patch_embed_kernel,
        out_shape=jax.ShapeDtypeStruct((M, Dp), out_dtype),
        grid_spec=pltpu.PrefetchScalarGridSpec(
            num_scalar_prefetch=0,
            grid=grid,
            in_specs=[
                pl.BlockSpec((TM, Kp), lambda i: (i, 0)),   # streamed patch tiles
                pl.BlockSpec((Kp, Dp), lambda i: (0, 0)),   # resident weight
                pl.BlockSpec((1, Dp), lambda i: (0, 0)),    # resident bias
            ],
            out_specs=pl.BlockSpec((TM, Dp), lambda i: (i, 0)),
        ),
        compiler_params=pltpu.CompilerParams(
            dimension_semantics=("parallel",),
            vmem_limit_bytes=vmem_limit,
            allow_input_fusion=(
                [True, False, False] if allow_input_fusion else None),
        ),
        cost_estimate=cost,
    )(patches, w_mat, b_mat)

    if Dp != D:
        out = out[:, :D]
    return out.reshape(B, N, D)


if __name__ == "__main__":
    # Small, deterministic config consistent with the module's forward:
    # batch=2, channels=4, spatial=16, patch_size=8 -> N=4 patches, embed_dim=32.
    B, C, H, W = 2, 4, 16, 16
    P = 8
    D = 32

    key = jax.random.PRNGKey(0)
    kx, kw, kb = jax.random.split(key, 3)
    x = jax.random.normal(kx, (B, C, H, W), dtype=jnp.float32)
    weight = jax.random.normal(kw, (D, C, P, P), dtype=jnp.float32) * 0.02
    bias = jax.random.normal(kb, (D,), dtype=jnp.float32) * 0.02

    fwd = jax.jit(functools.partial(patch_embedding, patch_size=P))
    out = jax.block_until_ready(fwd(x, weight, bias))

    # Reference: strided conv == patch matmul (pure XLA, f32). Tolerance widened
    # because the kernel computes and stores in bf16 (f32 accumulation).
    ref = jax.lax.conv_general_dilated(
        x, weight, window_strides=(P, P), padding="VALID",
        dimension_numbers=("NCHW", "OIHW", "NCHW"))
    ref = ref + bias.reshape(1, D, 1, 1)
    ref = ref.reshape(B, D, -1).transpose(0, 2, 1)

    assert out.shape == (B, (H // P) * (W // P), D)
    assert jnp.allclose(out.astype(jnp.float32), ref, atol=2e-2, rtol=2e-2)

    print("KERNEL_OK")
</pallas_src>

<mosaic_0001>
module attributes {stable_mosaic.version = 11 : i64} {
  func.func @_patch_embed_kernel(%arg0: i32, %arg1: memref<8x256xbf16, #tpu.memory_space<vmem>>, %arg2: memref<256x128xbf16, #tpu.memory_space<vmem>>, %arg3: memref<1x128xf32, #tpu.memory_space<vmem>>, %arg4: memref<8x128xbf16, #tpu.memory_space<vmem>>) attributes {dimension_semantics = [#tpu.dimension_semantics<parallel>], iteration_bounds = array<i64: 1>, scalar_prefetch = 0 : i64, scratch_operands = 0 : i64, tpu.core_type = #tpu.core_type<tc>, window_params = [{transform_indices = @transform_0, window_bounds = array<i64: 8, 256>}, {pipeline_mode = #tpu.pipeline_mode<synchronous>, transform_indices = @transform_1, window_bounds = array<i64: 256, 128>}, {pipeline_mode = #tpu.pipeline_mode<synchronous>, transform_indices = @transform_2, window_bounds = array<i64: 1, 128>}, {transform_indices = @transform_3, window_bounds = array<i64: 8, 128>}]} {
    %c0 = arith.constant 0 : index
    %c0_0 = arith.constant 0 : index
    %0 = vector.load %arg1[%c0, %c0_0] : memref<8x256xbf16, #tpu.memory_space<vmem>>, vector<8x256xbf16>
    %c0_1 = arith.constant 0 : index
    %c0_2 = arith.constant 0 : index
    %1 = vector.load %arg2[%c0_1, %c0_2] : memref<256x128xbf16, #tpu.memory_space<vmem>>, vector<256x128xbf16>
    %cst = arith.constant dense<0.000000e+00> : vector<8x128xf32>
    %2 = tpu.matmul %0, %1, %cst {dimension_numbers = #tpu.dot_dimension_numbers<[1], [0], [0], [1], [0, 0, 1, 1], [], []>} : vector<8x256xbf16>, vector<256x128xbf16>, vector<8x128xf32> -> vector<8x128xf32>
    %c0_3 = arith.constant 0 : index
    %c0_4 = arith.constant 0 : index
    %3 = vector.load %arg3[%c0_3, %c0_4] : memref<1x128xf32, #tpu.memory_space<vmem>>, vector<1x128xf32>
    %4 = vector.broadcast %3 : vector<1x128xf32> to vector<8x128xf32>
    %5 = arith.addf %2, %4 : vector<8x128xf32>
    %6 = arith.truncf %5 : vector<8x128xf32> to vector<8x128xbf16>
    %c0_5 = arith.constant 0 : index
    %c0_6 = arith.constant 0 : index
    %7 = vector.load %arg4[%c0_5, %c0_6] : memref<8x128xbf16, #tpu.memory_space<vmem>>, vector<8x128xbf16>
    tpu.vector_store %arg4[%c0_5, %c0_6], %6 {strides = array<i32>} : memref<8x128xbf16, #tpu.memory_space<vmem>>, vector<8x128xbf16>,
    return
  }
  func.func @transform_0(%arg0: i32) -> (i32, i32) {
    %c0_i32 = arith.constant 0 : i32
    %c0_i32_0 = arith.constant 0 : i32
    return %arg0, %c0_i32 : i32, i32
  }
  func.func @transform_1(%arg0: i32) -> (i32, i32) {
    %c0_i32 = arith.constant 0 : i32
    %c0_i32_0 = arith.constant 0 : i32
    %c0_i32_1 = arith.constant 0 : i32
    return %c0_i32, %c0_i32_0 : i32, i32
  }
  func.func @transform_2(%arg0: i32) -> (i32, i32) {
    %c0_i32 = arith.constant 0 : i32
    %c0_i32_0 = arith.constant 0 : i32
    %c0_i32_1 = arith.constant 0 : i32
    return %c0_i32, %c0_i32_0 : i32, i32
  }
  func.func @transform_3(%arg0: i32) -> (i32, i32) {
    %c0_i32 = arith.constant 0 : i32
    %c0_i32_0 = arith.constant 0 : i32
    return %arg0, %c0_i32 : i32, i32
  }
}

</mosaic_0001>

<bundles_post_ra>
// kernel: patch_embedding.1
= control target key start
LH: loop header
LB: loop body
LE: loop exit
PB: predicated region body
PF: predicated region fallthrough
CT: control target
= control target key end

     0   :  { %s386_s0 = inlined_call_operand.vmem [shape: bf16[8,256], index: 0, kind: input, shape index: {}]   ;;  %s387_s1 = inlined_call_operand.vmem [shape: bf16[256,128], index: 1, kind: input, shape index: {}]   ;;  %s388_s2 = inlined_call_operand.vmem [shape: f32[1,128], index: 2, kind: input, shape index: {}]   ;;  %s389_s3 = inlined_call_operand.hbm [shape: bf16[8,128], index: 3, kind: output, shape index: {}]  }
   0x1   :  { %v257_v0 = vld [vmem:[%s387_s1 + $0x40] sm:$0xff]   ;;  %v259_v2 = vld [vmem:[%s387_s1 + $0x48] sm:$0xff]   ;;  %v261_v4 = vld [vmem:[%s387_s1 + $0x50] sm:$0xff]  }
   0x2   :  { %v258_v1 = vld [vmem:[%s387_s1] sm:$0xff]   ;;  %234 = vmatprep.subr.bf16.mxu0 %v257_v0  ;;  %v260_v3 = vld [vmem:[%s387_s1 + $0x8] sm:$0xff]   ;;  %v262_v5 = vld [vmem:[%s387_s1 + $0x10] sm:$0xff]  }
   0x3   :  { %235 = vmatpush3.bf16.msra.mxu0 %v258_v1  ;;  %v263_v6 = vld [vmem:[%s387_s1 + $0x58] sm:$0xff]   ;;  %v265_v8 = vld [vmem:[%s387_s1 + $0x60] sm:$0xff]   ;;  %v267_v10 = vld [vmem:[%s387_s1 + $0x68] sm:$0xff]  }
   0x4   :  { %236 = vmatprep.subr.bf16.mxu0 %v259_v2  ;;  %v264_v7 = vld [vmem:[%s387_s1 + $0x18] sm:$0xff]   ;;  %v266_v9 = vld [vmem:[%s387_s1 + $0x20] sm:$0xff]  }
   0x5   :  { %v16_v11 = vld [vmem:[%s386_s0] sm:$0xff] }
   0x7   :  { %237 = vmatpush3.bf16.msra.mxu0 %v260_v3 }
   0x8   :  { %238 = vmatprep.subr.bf16.mxu0 %v261_v4 }
   0xb   :  { %239 = vmatpush3.bf16.msra.mxu0 %v262_v5 }
   0xc   :  { %240 = vmatprep.subr.bf16.mxu0 %v263_v6 }
   0xf   :  { %241 = vmatpush3.bf16.msra.mxu0 %v264_v7 }
  0x10   :  { %242 = vmatprep.subr.bf16.mxu0 %v265_v8 }
  0x11   :  { %8 = vsyncpa [#allocation3], 0  ;;  %v217_v12 = vcombine.high %v16_v11, %v16_v11  ;;  %v268_v13 = vld [vmem:[%s387_s1 + $0x28] sm:$0xff]   ;;  %v269_v14 = vld [vmem:[%s387_s1 + $0x70] sm:$0xff]   ;;  %v216_v18 = vcombine.low %v16_v11, %v16_v11  ;;  %s299_s20 = smov [#allocation2]  }
  0x12   :  { %v270_v15 = vld [vmem:[%s387_s1 + $0x30] sm:$0xff]   ;;  %v271_v16 = vld [vmem:[%s387_s1 + $0x78] sm:$0xff]   ;;  %v215_v20 = vld [vmem:[%s388_s2] ss:$0 sm:$0xff]  ;;  %s207_s21 = sshll.u32 %s299_s20, 4  ;;  %s208_s21 = int_to_ptr.vmem [resolvable:$true] %s207_s21 }
  0x13   :  { %243 = vmatpush3.bf16.msra.mxu0 %v266_v9  ;;  %191 = vmatprep.mubr.bf16.mxu0 %v217_v12  ;;  %v272_v17 = vld [vmem:[%s387_s1 + $0x38] sm:$0xff]   ;;  %s275_s1 = scalar_lea.vmem %s208_s21, 64  ;;  %p280_p1 = scmp.lt.s32.totalorder %s208_s21, %s208_s21 }
  0x14   :  { %244 = vmatprep.subr.bf16.mxu0 %v267_v10  ;;  %p276_p0 = scmp.ne.s32.totalorder %s208_s21, %s275_s1  ;;  %p281_p2 = scmp.lt.s32.totalorder %s275_s1, %s275_s1 }
  0x16   :  { %p282_p3 = por %p281_p2, %p280_p1 }
  0x17   :  { %245 = vmatpush3.bf16.msra.mxu0 %v268_v13 }
  0x18   :  { %246 = vmatprep.subr.bf16.mxu0 %v269_v14  ;;  %p283_p4 = pnand %p282_p3, %p276_p0 }
  0x1b   :  { %247 = vmatpush3.bf16.msra.mxu0 %v270_v15 }
  0x1c   :  { %248 = vmatprep.subr.bf16.mxu0 %v271_v16 }
  0x1f   :  { %249 = vmatpush3.bf16.msra.mxu0 %v272_v17 }
  0x22   :  { %192 = vmatmul.mubr.bf16.vlgmr.msra.gmra.mrb[0].mxu0 %v216_v18 }
  0xf5   :  { %v250_v19 = vpop.f32.mrb[0].mxu0 }
  0xf6   :  { %v251_v21 = vpop.f32.mrb[1].mxu0 }
  0xf7   :  { %v252_v22 = vadd.f32 %v251_v21, %v250_v19  ;;  %v253_v23 = vpop.f32.mrb[2].mxu0 }
  0xf8   :  { %v254_v24 = vpop.f32.mrb[3].mxu0 }
  0xf9   :  { %v194_v25 = vadd.f32 %v252_v22, %v215_v20 }
  0xfb   :  { %v199_v26 = vpack.c.bf16 %v194_v25, %v194_v25 }
  0xfd   :  { %200 = vst [vmem:[#allocation2] sm:$0xf] %v199_v26 }
  0xfe   :  { %286 = shalt.err (!%p283_p4)
}
  0xff   :  { %s287_s2 = scalar_lea.hbm %s389_s3, 64 }
 0x100   :  { %p288_p5 = scmp.ne.s32.totalorder %s389_s3, %s287_s2  ;;  %p291_p6 = scmp.lt.u32.totalorder %s287_s2, %s389_s3 }
 0x102   :  { %p293_p7 = pnand %p291_p6, %p288_p5 }
 0x104   :  { %296 = shalt.err (!%p293_p7)
}
 0x105   :  { %210 = dma.vmem_to_hbm [thread:$0]  %s208_s21, 64, %s389_s3, [#allocation3]  }
 0x106   :  { %297 = dma.done.wait [#allocation3], 64  }
 0x107   :  { %298 = vsyncadd [#allocation3], 4294967232 }
 0x108   :  { %214 = vsyncpa [#allocation3], 1 }

</bundles_post_ra>
